<compile_context>
chip_gen: v7x
topology: tpu7x:2x2x1
jax: 0.10.0
libtpu: 0.0.40
codegen_flags: <defaults>
</compile_context>

<pallas_src>
import jax
import jax.numpy as jnp
from jax.experimental import pallas as pl
from jax.experimental.pallas import tpu as pltpu

# ----------------------------- configuration -------------------------------
IMAGE_RES    = 16
PATCH        = 4
NUM_PATCHES  = (IMAGE_RES // PATCH) ** 2            # 16
PATCH_DIM    = 3 * PATCH * PATCH                    # 48
VISION_WIDTH = 64
TEXT_WIDTH   = 64
EMBED_DIM    = 32
HIDDEN       = 128
VOCAB        = 96
MAX_POS      = 16
QUEUE_SIZE   = 8
PAD_ID, CLS_ID, MASK_ID = 0, 1, 3
MLM_PROB     = 0.15
TEMP_INIT    = 0.07
MOMENTUM     = 0.995   # EMA update is a mathematical no-op right after copy_params()


# ----------------------------- Pallas kernels -------------------------------
def _linear_kernel(x_ref, w_ref, b_ref, o_ref):
    o_ref[...] = (jnp.dot(x_ref[...], w_ref[...],
                          preferred_element_type=jnp.float32) + b_ref[...])


def pallas_linear(x, w, b):
    """x:(M,K) @ w:(K,N) + b (bias broadcast over rows)."""
    M, K = x.shape
    N = w.shape[1]
    return pl.pallas_call(
        _linear_kernel,
        grid=(1,),
        in_specs=[pl.BlockSpec((M, K), lambda i: (0, 0)),
                  pl.BlockSpec((K, N), lambda i: (0, 0)),
                  pl.BlockSpec((1, N), lambda i: (0, 0))],
        out_specs=pl.BlockSpec((M, N), lambda i: (0, 0)),
        out_shape=jax.ShapeDtypeStruct((M, N), jnp.float32),
    )(x.astype(jnp.float32), w.astype(jnp.float32),
      b.astype(jnp.float32).reshape(1, N))


def _mlp_residual_kernel(x_ref, w1_ref, b1_ref, w2_ref, b2_ref, o_ref):
    # Fused residual MLP: out = x + (gelu(x@w1 + b1)) @ w2 + b2.
    # The HIDDEN-wide activation never leaves VMEM/vregs.
    x = x_ref[...]
    h = jax.nn.gelu(jnp.dot(x, w1_ref[...],
                            preferred_element_type=jnp.float32) + b1_ref[...])
    o_ref[...] = x + jnp.dot(h, w2_ref[...],
                             preferred_element_type=jnp.float32) + b2_ref[...]


def pallas_mlp_residual(x, w1, b1, w2, b2, block_m=256):
    """Fused residual MLP. Row-tiled parallel grid when M is large (v7x)."""
    M, D = x.shape
    H = w1.shape[1]
    if M >= 2 * block_m and M % block_m == 0:
        grid = (M // block_m,)
        x_spec = pl.BlockSpec((block_m, D), lambda i: (i, 0))
        o_spec = pl.BlockSpec((block_m, D), lambda i: (i, 0))
        cparams = pltpu.CompilerParams(dimension_semantics=("parallel",))
    else:
        grid = (1,)
        x_spec = pl.BlockSpec((M, D), lambda i: (0, 0))
        o_spec = pl.BlockSpec((M, D), lambda i: (0, 0))
        cparams = None
    return pl.pallas_call(
        _mlp_residual_kernel,
        grid=grid,
        in_specs=[x_spec,
                  pl.BlockSpec((D, H), lambda i: (0, 0)),
                  pl.BlockSpec((1, H), lambda i: (0, 0)),
                  pl.BlockSpec((H, D), lambda i: (0, 0)),
                  pl.BlockSpec((1, D), lambda i: (0, 0))],
        out_specs=o_spec,
        out_shape=jax.ShapeDtypeStruct((M, D), jnp.float32),
        compiler_params=cparams,
    )(x.astype(jnp.float32), w1.astype(jnp.float32),
      b1.astype(jnp.float32).reshape(1, H),
      w2.astype(jnp.float32), b2.astype(jnp.float32).reshape(1, D))


def _proj_norm_kernel(x_ref, w_ref, b_ref, o_ref):
    # Fused linear projection + L2-normalize (keeps (M,32) intermediate in VMEM).
    y = jnp.dot(x_ref[...], w_ref[...],
                preferred_element_type=jnp.float32) + b_ref[...]
    n = jnp.sqrt(jnp.sum(y * y, axis=-1, keepdims=True))
    o_ref[...] = y / jnp.maximum(n, 1e-12)


def pallas_proj_norm(x, w, b):
    M, K = x.shape
    N = w.shape[1]
    return pl.pallas_call(
        _proj_norm_kernel,
        grid=(1,),
        in_specs=[pl.BlockSpec((M, K), lambda i: (0, 0)),
                  pl.BlockSpec((K, N), lambda i: (0, 0)),
                  pl.BlockSpec((1, N), lambda i: (0, 0))],
        out_specs=pl.BlockSpec((M, N), lambda i: (0, 0)),
        out_shape=jax.ShapeDtypeStruct((M, N), jnp.float32),
    )(x.astype(jnp.float32), w.astype(jnp.float32),
      b.astype(jnp.float32).reshape(1, N))


def _contrastive_kernel(lhs_ref, rhs_ref, sc_ref, o_ref):
    # One MXU matmul produces all 6 similarity blocks; targets (eye + alpha
    # soft-distill) and the 4 soft cross-entropies are computed in-kernel.
    inv_t = 1.0 / sc_ref[0]
    alpha = sc_ref[1]
    S = jnp.dot(lhs_ref[...], rhs_ref[...],
                preferred_element_type=jnp.float32) * inv_t            # (4B, 2K)
    B = S.shape[0] // 4
    K = S.shape[1] // 2

    sim_i2t_m = S[0 * B:1 * B, 0:K]
    sim_t2i_m = S[1 * B:2 * B, K:2 * K]
    sim_i2t   = S[2 * B:3 * B, 0:K]
    sim_i2i   = S[2 * B:3 * B, K:2 * K]
    sim_t2t   = S[3 * B:4 * B, 0:K]
    sim_t2i   = S[3 * B:4 * B, K:2 * K]

    eye = (jax.lax.broadcasted_iota(jnp.int32, (B, K), 0) ==
           jax.lax.broadcasted_iota(jnp.int32, (B, K), 1)).astype(jnp.float32)

    def _softmax(z):
        m = jnp.max(z, axis=-1, keepdims=True)
        e = jnp.exp(z - m)
        return e / jnp.sum(e, axis=-1, keepdims=True)

    def _soft_xent_mean(z, t):                      # returns (1, 1)
        m = jnp.max(z, axis=-1, keepdims=True)
        lse = m + jnp.log(jnp.sum(jnp.exp(z - m), axis=-1, keepdims=True))
        per_row = jnp.sum(-(z - lse) * t, axis=-1, keepdims=True)
        return jnp.sum(per_row, axis=0, keepdims=True) / float(z.shape[0])

    i2t_tgt = alpha * _softmax(sim_i2t_m) + (1.0 - alpha) * eye
    t2i_tgt = alpha * _softmax(sim_t2i_m) + (1.0 - alpha) * eye

    total = (_soft_xent_mean(sim_i2t, i2t_tgt) +
             _soft_xent_mean(sim_t2i, t2i_tgt) +
             _soft_xent_mean(sim_i2i, eye) +
             _soft_xent_mean(sim_t2t, eye))
    o_ref[...] = total                              # (1,1): i2t+t2i+i2i+t2t


def pallas_contrastive_loss(lhs, rhs, temp, alpha):
    M, D = lhs.shape
    K2 = rhs.shape[1]
    scalars = jnp.stack([temp.astype(jnp.float32),
                         jnp.asarray(alpha, jnp.float32)])
    out = pl.pallas_call(
        _contrastive_kernel,
        grid=(1,),
        in_specs=[pl.BlockSpec((M, D), lambda i: (0, 0)),
                  pl.BlockSpec((D, K2), lambda i: (0, 0)),
                  pl.BlockSpec(memory_space=pltpu.MemorySpace.SMEM)],
        out_specs=pl.BlockSpec((1, 1), lambda i: (0, 0)),
        out_shape=jax.ShapeDtypeStruct((1, 1), jnp.float32),
    )(lhs.astype(jnp.float32), rhs.astype(jnp.float32), scalars)
    return out[0, 0]


def _g2l_kernel(l_ref, lt_ref, g_ref, attn_ref, attnf_ref, sc_ref, o_ref):
    # Fused in_batch_g2l_loss.  Negatives via MXU dot (g @ l^T) in a flat
    # (N, N*L) layout; masking, log-softmax over [pos, negatives] and the
    # masked mean all in-kernel.
    inv_t = 1.0 / sc_ref[0]
    l = l_ref[...]                      # (N, L, D)  per-sentence (local) feats
    g = g_ref[...]                      # (N, D)     global image features
    attn = attn_ref[...]                # (N, L)     sentence validity mask
    attn_f = attnf_ref[...]             # (1, N*L)   same mask, flattened
    N, L, D = l.shape
    NL = N * L

    u_p = jnp.sum(l * g[:, None, :], axis=2) * inv_t                    # (N, L)
    u_p = attn * u_p + 10000.0 * (1.0 - attn)

    u_n = jnp.dot(g, lt_ref[...], preferred_element_type=jnp.float32) * inv_t  # (N, N*L)
    row_i = jax.lax.broadcasted_iota(jnp.int32, (N, NL), 0)
    col_j = jax.lax.broadcasted_iota(jnp.int32, (N, NL), 1) // L
    eye_f = (row_i == col_j).astype(jnp.float32)
    u_n = (1.0 - eye_f) * u_n - 10000.0 * eye_f
    u_n = attn_f * u_n - 10000.0 * (1.0 - attn_f)

    # logsumexp over [u_p[i,j]] ++ u_n[i, :]  (negatives shared per anchor i)
    neg_max = jnp.max(u_n, axis=1, keepdims=True)                       # (N, 1)
    neg_sum = jnp.sum(jnp.exp(u_n - neg_max), axis=1, keepdims=True)    # (N, 1)
    row_max = jnp.maximum(u_p, neg_max)                                 # (N, L)
    denom = jnp.exp(u_p - row_max) + neg_sum * jnp.exp(neg_max - row_max)
    lse = row_max + jnp.log(denom)
    neg_logp0 = lse - u_p                                               # -log p(pos)

    n_valid = jnp.maximum(jnp.sum(attn, axis=1, keepdims=True), 1.0)    # guard
    per_anchor = jnp.sum(neg_logp0, axis=1, keepdims=True) / n_valid    # (N, 1)
    o_ref[...] = jnp.sum(per_anchor, axis=0, keepdims=True) / float(N)  # (1, 1)


def pallas_g2l_loss(l, g, attn, temp):
    N, L, D = l.shape
    l_t = jnp.transpose(l.reshape(N * L, D))                    # (D, N*L)
    attn_f = attn.reshape(1, N * L)
    out = pl.pallas_call(
        _g2l_kernel,
        grid=(1,),
        in_specs=[pl.BlockSpec((N, L, D), lambda i: (0, 0, 0)),
                  pl.BlockSpec((D, N * L), lambda i: (0, 0)),
                  pl.BlockSpec((N, D), lambda i: (0, 0)),
                  pl.BlockSpec((N, L), lambda i: (0, 0)),
                  pl.BlockSpec((1, N * L), lambda i: (0, 0)),
                  pl.BlockSpec(memory_space=pltpu.MemorySpace.SMEM)],
        out_specs=pl.BlockSpec((1, 1), lambda i: (0, 0)),
        out_shape=jax.ShapeDtypeStruct((1, 1), jnp.float32),
    )(l.astype(jnp.float32), l_t.astype(jnp.float32), g.astype(jnp.float32),
      attn.astype(jnp.float32), attn_f.astype(jnp.float32),
      jnp.reshape(temp, (1,)).astype(jnp.float32))
    return out[0, 0]


def _itm_loss_kernel(cls_ref, w_ref, b_ref, o_ref):
    # Fused ITM head + hard cross-entropy (labels built in-kernel: first bs
    # rows are positives). Scalar (1,1) output => no lane-sparse stores.
    z = jnp.dot(cls_ref[...], w_ref[...],
                preferred_element_type=jnp.float32) + b_ref[...]        # (3B, 2)
    T = z.shape[0]
    bs = T // 3
    labels = (jax.lax.broadcasted_iota(jnp.int32, (T, 1), 0) < bs).astype(jnp.int32)
    m = jnp.max(z, axis=-1, keepdims=True)
    lse = m + jnp.log(jnp.sum(jnp.exp(z - m), axis=-1, keepdims=True))
    iota_c = jax.lax.broadcasted_iota(jnp.int32, z.shape, 1)
    picked = jnp.sum(z * (iota_c == labels).astype(jnp.float32),
                     axis=-1, keepdims=True)
    nll = lse - picked                                                  # (T, 1)
    o_ref[...] = jnp.sum(nll, axis=0, keepdims=True) / float(T)         # (1, 1)


def pallas_itm_loss(cls_rows, w, b):
    T, D = cls_rows.shape
    out = pl.pallas_call(
        _itm_loss_kernel,
        grid=(1,),
        in_specs=[pl.BlockSpec((T, D), lambda i: (0, 0)),
                  pl.BlockSpec((D, 2), lambda i: (0, 0)),
                  pl.BlockSpec((1, 2), lambda i: (0, 0))],
        out_specs=pl.BlockSpec((1, 1), lambda i: (0, 0)),
        out_shape=jax.ShapeDtypeStruct((1, 1), jnp.float32),
    )(cls_rows.astype(jnp.float32), w.astype(jnp.float32),
      b.astype(jnp.float32).reshape(1, 2))
    return out[0, 0]


def _mlm_loss_kernel(h_ref, w_ref, b_ref, lab_ref, sc_ref, o_ref):
    # Fused MLM head (student + momentum logits in one matmul), momentum
    # softmax, hard CE (ignore_index=-100) and soft distillation CE; scalar out.
    alpha = sc_ref[0]
    logits_all = jnp.dot(h_ref[...], w_ref[...],
                         preferred_element_type=jnp.float32) + b_ref[...]   # (2T, V)
    T2, V = logits_all.shape
    T = T2 // 2
    logits = logits_all[:T]          # student
    logits_m = logits_all[T:]        # momentum (teacher)

    mm = jnp.max(logits_m, axis=-1, keepdims=True)
    em = jnp.exp(logits_m - mm)
    soft = em / jnp.sum(em, axis=-1, keepdims=True)

    m = jnp.max(logits, axis=-1, keepdims=True)
    lse = m + jnp.log(jnp.sum(jnp.exp(logits - m), axis=-1, keepdims=True))
    logp = logits - lse

    lab = lab_ref[...]                                                  # (T, 1)
    iota_c = jax.lax.broadcasted_iota(jnp.int32, (T, V), 1)
    onehot = (iota_c == lab).astype(jnp.float32)
    valid = (lab >= 0).astype(jnp.float32)                              # (T, 1)

    nll = (lse - jnp.sum(logits * onehot, axis=-1, keepdims=True)) * valid
    sxe = -jnp.sum(logp * soft, axis=-1, keepdims=True) * valid
    n_valid = jnp.maximum(jnp.sum(valid, axis=0, keepdims=True), 1.0)   # (1,1)
    loss_ce = jnp.sum(nll, axis=0, keepdims=True) / n_valid
    loss_dist = jnp.sum(sxe, axis=0, keepdims=True) / n_valid
    o_ref[...] = (1.0 - alpha) * loss_ce + alpha * loss_dist            # (1,1)


def pallas_mlm_loss(hidden, hidden_m, w, b, labels, alpha):
    T, D = hidden.shape
    h_all = jnp.concatenate([hidden, hidden_m], axis=0)                 # (2T, D)
    out = pl.pallas_call(
        _mlm_loss_kernel,
        grid=(1,),
        in_specs=[pl.BlockSpec((2 * T, D), lambda i: (0, 0)),
                  pl.BlockSpec((D, VOCAB), lambda i: (0, 0)),
                  pl.BlockSpec((1, VOCAB), lambda i: (0, 0)),
                  pl.BlockSpec((T, 1), lambda i: (0, 0)),
                  pl.BlockSpec(memory_space=pltpu.MemorySpace.SMEM)],
        out_specs=pl.BlockSpec((1, 1), lambda i: (0, 0)),
        out_shape=jax.ShapeDtypeStruct((1, 1), jnp.float32),
    )(h_all.astype(jnp.float32), w.astype(jnp.float32),
      b.astype(jnp.float32).reshape(1, VOCAB),
      labels.astype(jnp.int32),
      jnp.reshape(jnp.asarray(alpha, jnp.float32), (1,)))
    return out[0, 0]


# --------------------------- stand-in encoders ------------------------------
def visual_encoder(p, images):
    """ViT stand-in: patch-embed + CLS + pos-embed + fused residual MLP."""
    B, C, H, W = images.shape
    nph, npw = H // PATCH, W // PATCH
    patches = images.reshape(B, C, nph, PATCH, npw, PATCH)
    patches = patches.transpose(0, 2, 4, 1, 3, 5).reshape(B * nph * npw,
                                                          C * PATCH * PATCH)
    x = pallas_linear(patches, p['vit']['patch_w'],
                      p['vit']['patch_b']).reshape(B, nph * npw, VISION_WIDTH)
    cls = jnp.broadcast_to(p['vit']['cls'], (B, 1, VISION_WIDTH))
    x = jnp.concatenate([cls, x], axis=1) + p['vit']['pos']
    xf = x.reshape(B * (nph * npw + 1), VISION_WIDTH)
    out = pallas_mlp_residual(xf, p['vit']['w1'], p['vit']['b1'],
                              p['vit']['w2'], p['vit']['b2'])
    return out.reshape(B, nph * npw + 1, VISION_WIDTH)


def text_encoder(p, ids, attn_mask):
    """BERT stand-in: token+pos embedding + fused residual MLP."""
    B, L = ids.shape
    emb = jnp.take(p['txt']['tok_emb'], ids, axis=0) + p['txt']['pos_emb'][:L][None]
    emb = emb * attn_mask[..., None].astype(jnp.float32)
    xf = emb.reshape(B * L, TEXT_WIDTH)
    out = pallas_mlp_residual(xf, p['txt']['w1'], p['txt']['b1'],
                              p['txt']['w2'], p['txt']['b2'])
    return out.reshape(B, L, TEXT_WIDTH)


def fusion_encoder(p, text_embeds, text_mask, image_embeds, image_atts):
    """Fusion-BERT stand-in: pooled-image context injection + fused residual MLP."""
    B, L, D = text_embeds.shape
    ia = image_atts[..., None].astype(jnp.float32)
    img_pool = jnp.sum(image_embeds * ia, axis=1) / jnp.maximum(jnp.sum(ia, axis=1), 1.0)
    img_ctx = pallas_linear(img_pool, p['fus']['i2t_w'], p['fus']['i2t_b'])
    h0 = (text_embeds + img_ctx[:, None, :]) * text_mask[..., None].astype(jnp.float32)
    hf = h0.reshape(B * L, D)
    out = pallas_mlp_residual(hf, p['fus']['w1'], p['fus']['b1'],
                              p['fus']['w2'], p['fus']['b2'])
    return out.reshape(B, L, D)


# --------------------------- parameter init ---------------------------------
def init_params_and_state(key):
    def nrm(k, shape, scale=0.02):
        return scale * jax.random.normal(k, shape, jnp.float32)
    ks = iter(jax.random.split(key, 24))
    params = {
        'vit': {'patch_w': nrm(next(ks), (PATCH_DIM, VISION_WIDTH)),
                'patch_b': jnp.zeros((VISION_WIDTH,), jnp.float32),
                'cls': nrm(next(ks), (1, 1, VISION_WIDTH)),
                'pos': nrm(next(ks), (1, NUM_PATCHES + 1, VISION_WIDTH)),
                'w1': nrm(next(ks), (VISION_WIDTH, HIDDEN)),
                'b1': jnp.zeros((HIDDEN,), jnp.float32),
                'w2': nrm(next(ks), (HIDDEN, VISION_WIDTH)),
                'b2': jnp.zeros((VISION_WIDTH,), jnp.float32)},
        'txt': {'tok_emb': nrm(next(ks), (VOCAB, TEXT_WIDTH)),
                'pos_emb': nrm(next(ks), (MAX_POS, TEXT_WIDTH)),
                'w1': nrm(next(ks), (TEXT_WIDTH, HIDDEN)),
                'b1': jnp.zeros((HIDDEN,), jnp.float32),
                'w2': nrm(next(ks), (HIDDEN, TEXT_WIDTH)),
                'b2': jnp.zeros((TEXT_WIDTH,), jnp.float32)},
        'fus': {'i2t_w': nrm(next(ks), (VISION_WIDTH, TEXT_WIDTH)),
                'i2t_b': jnp.zeros((TEXT_WIDTH,), jnp.float32),
                'w1': nrm(next(ks), (TEXT_WIDTH, HIDDEN)),
                'b1': jnp.zeros((HIDDEN,), jnp.float32),
                'w2': nrm(next(ks), (HIDDEN, TEXT_WIDTH)),
                'b2': jnp.zeros((TEXT_WIDTH,), jnp.float32),
                'mlm_w': nrm(next(ks), (TEXT_WIDTH, VOCAB)),
                'mlm_b': jnp.zeros((VOCAB,), jnp.float32)},
        'vproj_w': nrm(next(ks), (VISION_WIDTH, EMBED_DIM)),
        'vproj_b': jnp.zeros((EMBED_DIM,), jnp.float32),
        'tproj_w': nrm(next(ks), (TEXT_WIDTH, EMBED_DIM)),
        'tproj_b': jnp.zeros((EMBED_DIM,), jnp.float32),
        'itm_w': nrm(next(ks), (TEXT_WIDTH, 2)),
        'itm_b': jnp.zeros((2,), jnp.float32),
        'temp': jnp.array(TEMP_INIT, jnp.float32),
    }
    iq = jax.random.normal(next(ks), (EMBED_DIM, QUEUE_SIZE), jnp.float32)
    tq = jax.random.normal(next(ks), (EMBED_DIM, QUEUE_SIZE), jnp.float32)
    iq = iq / jnp.maximum(jnp.linalg.norm(iq, axis=0, keepdims=True), 1e-12)
    tq = tq / jnp.maximum(jnp.linalg.norm(tq, axis=0, keepdims=True), 1e-12)
    state = {'image_queue': iq, 'text_queue': tq, 'queue_ptr': 0}
    return params, state


# ------------------------------- forward ------------------------------------
def xvl_forward(params, state, image, image_aug, text_ids, text_mask,
                sent_ids, sent_mask, alpha=0.0, key=None):
    temp = jnp.clip(params['temp'], 0.001, 0.5)
    bs = image.shape[0]
    B, L = text_ids.shape

    # --- MLM token masking (depends only on text_ids + RNG; done up front so
    #     the masked sequence joins the single batched text-encoder pass) ---
    # TODO(synk): torch.bernoulli RNG semantics not reproduced bit-exactly; jax.random used.
    k1, k2, k3, k4 = jax.random.split(key, 4)
    masked = jax.random.bernoulli(k1, MLM_PROB, text_ids.shape)
    masked = masked & (text_ids != PAD_ID) & (text_ids != CLS_ID)
    masked = masked.at[0, 2].set(True)   # deterministic guard: at least one masked token
    mlm_labels = jnp.where(masked, text_ids, -100)
    replaced = jax.random.bernoulli(k2, 0.8, text_ids.shape) & masked
    input_ids = jnp.where(replaced, MASK_ID, text_ids)
    rand_sel = jax.random.bernoulli(k3, 0.5, text_ids.shape) & masked & (~replaced)
    random_words = jax.random.randint(k4, text_ids.shape, 0, VOCAB)
    input_ids = jnp.where(rand_sel, random_words, input_ids)

    # --- visual encoder: one batched pass over [image_aug ; image] ---
    # (momentum branch shares weights: copy_params() => identical; EMA no-op)
    image_embeds_both = visual_encoder(params, jnp.concatenate([image_aug, image], 0))
    image_embeds   = image_embeds_both[:bs]        # online branch (augmented)
    image_embeds_m = image_embeds_both[bs:]        # momentum branch (raw image)
    image_atts = jnp.ones(image_embeds.shape[:-1], jnp.int32)

    img_feat_both = pallas_proj_norm(image_embeds_both[:, 0, :],
                                     params['vproj_w'], params['vproj_b'])
    image_feat   = img_feat_both[:bs]
    image_feat_m = img_feat_both[bs:]

    # --- text encoder: one batched pass over [text_ids ; masked ids ; sentences] ---
    # TODO(synk): tokenizer / sentence splitting have no Pallas equivalent; inputs
    # are pre-tokenized ids (CLS=1, PAD=0) and pre-split sentence ids + mask.
    Bq, S, SL = sent_ids.shape
    sent_flat = sent_ids.reshape(Bq * S, SL)
    if SL < L:
        sent_flat = jnp.pad(sent_flat, ((0, 0), (0, L - SL)))   # PAD_ID == 0
    sent_tok_mask = (sent_flat != PAD_ID).astype(jnp.int32)
    ids_all = jnp.concatenate([text_ids, input_ids, sent_flat], axis=0)
    mask_all = jnp.concatenate([text_mask, text_mask, sent_tok_mask], axis=0)
    text_out_all = text_encoder(params, ids_all, mask_all)
    text_embeds  = text_out_all[:B]            # == momentum text_output_m (dedup)
    text_out_mlm = text_out_all[B:2 * B]       # student == momentum MLM pass (dedup)
    sent_out     = text_out_all[2 * B:]

    txt_cls = jnp.concatenate([text_embeds[:, 0, :], sent_out[:, 0, :]], axis=0)
    txt_feat_rows = pallas_proj_norm(txt_cls, params['tproj_w'], params['tproj_b'])
    text_feat   = txt_feat_rows[:B]
    text_feat_m = text_feat                    # momentum == online (identical weights/input)
    sent_feat   = txt_feat_rows[B:]
    text_feat_m_l = sent_feat.reshape(Bq, S, EMBED_DIM) * sent_mask[..., None]

    # --- contrastive (ITA): one fused kernel for all sims + targets + 4 losses ---
    image_feat_all = jnp.concatenate([image_feat_m.T, state['image_queue']], axis=1)
    text_feat_all  = jnp.concatenate([text_feat_m.T,  state['text_queue']],  axis=1)
    lhs = jnp.concatenate([image_feat_m, text_feat_m, image_feat, text_feat], axis=0)
    rhs = jnp.concatenate([text_feat_all, image_feat_all], axis=1)
    loss4 = pallas_contrastive_loss(lhs, rhs, temp, alpha)   # i2t + t2i + i2i + t2t
    loss_t2i_inMod_l = pallas_g2l_loss(text_feat_m_l, image_feat, sent_mask, temp)
    loss_ita = (loss4 + loss_t2i_inMod_l) / 5.0

    # --- dequeue & enqueue (functional) ---
    # TODO(synk): concat_all_gather (torch.distributed) is identity on a single device.
    ptr = state['queue_ptr']
    new_state = {
        'image_queue': jax.lax.dynamic_update_slice(state['image_queue'],
                                                    image_feat_m.T, (0, ptr)),
        'text_queue': jax.lax.dynamic_update_slice(state['text_queue'],
                                                   text_feat_m.T, (0, ptr)),
        'queue_ptr': (ptr + bs) % QUEUE_SIZE,
    }

    # --- ITM + MLM: one batched fusion pass over 5*bs sequences ---
    # TODO(synk): torch.multinomial + cosine-similarity rejection loop replaced by
    # deterministic roll-by-1 negatives (data-dependent host-side sampling).
    neg_idx = (jnp.arange(bs) + 1) % bs
    image_embeds_neg = image_embeds[neg_idx]
    text_embeds_neg = text_embeds[neg_idx]
    text_atts_neg = text_mask[neg_idx]

    fus_text = jnp.concatenate([text_embeds, text_embeds, text_embeds_neg,
                                text_out_mlm, text_out_mlm], axis=0)
    fus_mask = jnp.concatenate([text_mask, text_mask, text_atts_neg,
                                text_mask, text_mask], axis=0)
    fus_img = jnp.concatenate([image_embeds, image_embeds_neg, image_embeds,
                               image_embeds, image_embeds_m], axis=0)
    fus_atts = jnp.ones(fus_img.shape[:-1], jnp.int32)
    fus_out = fusion_encoder(params, fus_text, fus_mask, fus_img, fus_atts)

    # rows 0..bs-1: positive pairs, bs..3bs-1: the two negative halves (same
    # ordering as the original output_pos/output_neg concatenation).
    itm_cls = fus_out[:3 * bs, 0, :]
    loss_itm = pallas_itm_loss(itm_cls, params['itm_w'], params['itm_b'])

    mlm_hidden   = fus_out[3 * bs:4 * bs].reshape(B * L, TEXT_WIDTH)   # student
    mlm_hidden_m = fus_out[4 * bs:5 * bs].reshape(B * L, TEXT_WIDTH)   # momentum
    loss_mlm = pallas_mlm_loss(mlm_hidden, mlm_hidden_m,
                               params['fus']['mlm_w'], params['fus']['mlm_b'],
                               mlm_labels.reshape(-1, 1), alpha)

    return (loss_mlm, loss_ita, loss_itm), new_state


# --------------------------------- main --------------------------------------
if __name__ == "__main__":
    key = jax.random.PRNGKey(0)
    kp, kimg, kaug, kmlm = jax.random.split(key, 4)
    params, state = init_params_and_state(kp)

    image = jax.random.normal(kimg, (2, 3, IMAGE_RES, IMAGE_RES), jnp.float32)
    image_aug = jax.random.normal(kaug, (2, 3, IMAGE_RES, IMAGE_RES), jnp.float32)

    text_ids = jnp.array([[1, 10, 23, 45, 7, 12, 0, 0],
                          [1, 33, 9, 27, 5, 0, 0, 0]], jnp.int32)
    text_mask = (text_ids != PAD_ID).astype(jnp.int32)
    sent_ids = jnp.array([[[1, 10, 23, 0], [1, 45, 7, 12], [0, 0, 0, 0]],
                          [[1, 33, 9, 0], [1, 27, 5, 0], [1, 6, 0, 0]]], jnp.int32)
    sent_mask = jnp.array([[1.0, 1.0, 0.0], [1.0, 1.0, 1.0]], jnp.float32)

    (loss_mlm, loss_ita, loss_itm), new_state = xvl_forward(
        params, state, image, image_aug, text_ids, text_mask,
        sent_ids, sent_mask, alpha=0.0, key=kmlm)

    jax.block_until_ready((loss_mlm, loss_ita, loss_itm,
                           new_state['image_queue'], new_state['text_queue']))
    print("KERNEL_OK")
</pallas_src>

<mosaic_0001>
module attributes {stable_mosaic.version = 11 : i64} {
  func.func @_linear_kernel(%arg0: i32, %arg1: memref<64x48xf32, #tpu.memory_space<vmem>>, %arg2: memref<48x64xf32, #tpu.memory_space<vmem>>, %arg3: memref<1x64xf32, #tpu.memory_space<vmem>>, %arg4: memref<64x64xf32, #tpu.memory_space<vmem>>) attributes {dimension_semantics = [#tpu.dimension_semantics<arbitrary>], iteration_bounds = array<i64: 1>, scalar_prefetch = 0 : i64, scratch_operands = 0 : i64, tpu.core_type = #tpu.core_type<tc>, window_params = [{pipeline_mode = #tpu.pipeline_mode<synchronous>, transform_indices = @transform_0, window_bounds = array<i64: 64, 48>}, {pipeline_mode = #tpu.pipeline_mode<synchronous>, transform_indices = @transform_1, window_bounds = array<i64: 48, 64>}, {pipeline_mode = #tpu.pipeline_mode<synchronous>, transform_indices = @transform_2, window_bounds = array<i64: 1, 64>}, {pipeline_mode = #tpu.pipeline_mode<synchronous>, transform_indices = @transform_3, window_bounds = array<i64: 64, 64>}]} {
    %c0 = arith.constant 0 : index
    %c0_0 = arith.constant 0 : index
    %0 = vector.load %arg1[%c0, %c0_0] : memref<64x48xf32, #tpu.memory_space<vmem>>, vector<64x48xf32>
    %c0_1 = arith.constant 0 : index
    %c0_2 = arith.constant 0 : index
    %1 = vector.load %arg2[%c0_1, %c0_2] : memref<48x64xf32, #tpu.memory_space<vmem>>, vector<48x64xf32>
    %cst = arith.constant dense<0.000000e+00> : vector<64x64xf32>
    %2 = tpu.matmul %0, %1, %cst {dimension_numbers = #tpu.dot_dimension_numbers<[1], [0], [0], [1], [0, 0, 1, 1], [], []>} : vector<64x48xf32>, vector<48x64xf32>, vector<64x64xf32> -> vector<64x64xf32>
    %c0_3 = arith.constant 0 : index
    %c0_4 = arith.constant 0 : index
    %3 = vector.load %arg3[%c0_3, %c0_4] : memref<1x64xf32, #tpu.memory_space<vmem>>, vector<1x64xf32>
    %4 = vector.broadcast %3 : vector<1x64xf32> to vector<64x64xf32>
    %5 = arith.addf %2, %4 : vector<64x64xf32>
    %c0_5 = arith.constant 0 : index
    %c0_6 = arith.constant 0 : index
    %6 = vector.load %arg4[%c0_5, %c0_6] : memref<64x64xf32, #tpu.memory_space<vmem>>, vector<64x64xf32>
    tpu.vector_store %arg4[%c0_5, %c0_6], %5 {strides = array<i32>} : memref<64x64xf32, #tpu.memory_space<vmem>>, vector<64x64xf32>,
    return
  }
  func.func @transform_0(%arg0: i32) -> (i32, i32) {
    %c0_i32 = arith.constant 0 : i32
    %c0_i32_0 = arith.constant 0 : i32
    %c0_i32_1 = arith.constant 0 : i32
    return %c0_i32, %c0_i32_0 : i32, i32
  }
  func.func @transform_1(%arg0: i32) -> (i32, i32) {
    %c0_i32 = arith.constant 0 : i32
    %c0_i32_0 = arith.constant 0 : i32
    %c0_i32_1 = arith.constant 0 : i32
    return %c0_i32, %c0_i32_0 : i32, i32
  }
  func.func @transform_2(%arg0: i32) -> (i32, i32) {
    %c0_i32 = arith.constant 0 : i32
    %c0_i32_0 = arith.constant 0 : i32
    %c0_i32_1 = arith.constant 0 : i32
    return %c0_i32, %c0_i32_0 : i32, i32
  }
  func.func @transform_3(%arg0: i32) -> (i32, i32) {
    %c0_i32 = arith.constant 0 : i32
    %c0_i32_0 = arith.constant 0 : i32
    %c0_i32_1 = arith.constant 0 : i32
    return %c0_i32, %c0_i32_0 : i32, i32
  }
}

</mosaic_0001>

<bundles_post_ra>
// kernel: tpu_custom_call.1
= control target key start
LH: loop header
LB: loop body
LE: loop exit
PB: predicated region body
PF: predicated region fallthrough
CT: control target
= control target key end

     0   :  { %vm36_vm0 = vcmask 392192   ;;  %s379_s0 = inlined_call_operand.vmem [shape: f32[64,48], index: 0, kind: input, shape index: {}]   ;;  %s380_s1 = inlined_call_operand.vmem [shape: f32[48,64], index: 1, kind: input, shape index: {}]   ;;  %s381_s2 = inlined_call_operand.vmem [shape: f32[1,64], index: 2, kind: input, shape index: {}]   ;;  %s382_s3 = inlined_call_operand.hbm [shape: f32[64,64], index: 3, kind: output, shape index: {}]  }
   0x1   :  { %v23_v0 = vld [vmem:[%s380_s1] sm:$0xff]  ;;  %v24_v1 = vld [vmem:[%s380_s1 + $0x8] sm:$0xff]  ;;  %v25_v2 = vld [vmem:[%s380_s1 + $0x10] sm:$0xff] }
   0x2   :  { %v238_v3 = vpack.c.bf16 %v24_v1, %v23_v0  ;;  %v26_v4 = vld [vmem:[%s380_s1 + $0x18] sm:$0xff]  ;;  %v27_v6 = vld [vmem:[%s380_s1 + $0x20] sm:$0xff]  ;;  %v28_v7 = vld [vmem:[%s380_s1 + $0x28] sm:$0xff] }
   0x3   :  { %v242_v5 = vpack.c.bf16 %v26_v4, %v25_v2  ;;  %v15_v8 = vld [vmem:[%s379_s0] sm:$0xff] }
   0x4   :  { %239 = vmatprep.subr.bf16.mxu0 %v238_v3  ;;  %250 = vmatprep.subr.bf16.mxu1 %v238_v3  ;;  %v19_v9 = vld [vmem:[%s379_s0 + $0x20] sm:$0xff] }
   0x5   :  { %241 = vmatpush3.bf16.msra.mxu0 %v238_v3  ;;  %253 = vmatpush3.bf16.msra.mxu1 %v238_v3 }
   0x6   :  { %8 = vsyncpa [#allocation3], 0  ;;  %243 = vmatprep.subr.bf16.mxu0 %v242_v5  ;;  %251 = vmatprep.subr.bf16.mxu1 %v242_v5  ;;  %v246_v10 = vpack.c.bf16 %v28_v7, %v27_v6  ;;  %v16_v11 = vld [vmem:[%s379_s0 + $0x8] sm:$0xff]  ;;  %v17_v13 = vld [vmem:[%s379_s0 + $0x10] sm:$0xff]  ;;  %vm166_vm1 = vcmask 523264   ;;  %s283_s14 = smov [#allocation2]  }
   0x7   :  { %226 = vmatprep.mubr.msk.f32.mxu0 %vm36_vm0, %v15_v8  ;;  %232 = vmatprep.mubr.msk.f32.mxu1 %vm36_vm0, %v19_v9  ;;  %v20_v12 = vld [vmem:[%s379_s0 + $0x28] sm:$0xff]  ;;  %v21_v14 = vld [vmem:[%s379_s0 + $0x30] sm:$0xff]  ;;  %v18_v15 = vld [vmem:[%s379_s0 + $0x18] sm:$0xff]  ;;  %s180_s15 = sshll.u32 %s283_s14, 4  ;;  %s181_s15 = int_to_ptr.vmem [resolvable:$true] %s180_s15 }
   0x8   :  { %v22_v16 = vld [vmem:[%s379_s0 + $0x38] sm:$0xff]  ;;  %v191_v17 = vld [vmem:[%s381_s2] ss:$0 sm:$0xff]  ;;  %s259_s0 = scalar_lea.vmem %s181_s15, 1024  ;;  %p264_p1 = scmp.lt.s32.totalorder %s181_s15, %s181_s15 }
   0x9   :  { %245 = vmatpush3.bf16.msra.mxu0 %v242_v5  ;;  %254 = vmatpush3.bf16.msra.mxu1 %v242_v5  ;;  %p260_p0 = scmp.ne.s32.totalorder %s181_s15, %s259_s0  ;;  %p265_p2 = scmp.lt.s32.totalorder %s259_s0, %s259_s0 }
   0xa   :  { %247 = vmatprep.subr.bf16.mxu0 %v246_v10  ;;  %252 = vmatprep.subr.bf16.mxu1 %v246_v10 }
   0xb   :  { %p266_p3 = por %p265_p2, %p264_p1 }
   0xd   :  { %249 = vmatpush3.bf16.msra.mxu0 %v246_v10  ;;  %255 = vmatpush3.bf16.msra.mxu1 %v246_v10  ;;  %p267_p4 = pnand %p266_p3, %p260_p0 }
  0x10   :  { %227 = vmatmul.mubr.msk.f32.vlgmr.msra.gmra.mrb[0].mxu0 %vm36_vm0, %v16_v11  ;;  %233 = vmatmul.mubr.msk.f32.vlgmr.msra.gmra.mrb[0].mxu1 %vm36_vm0, %v20_v12 }
  0x11   :  { %229 = vmatprep.mubr.msk.f32.mxu0 %vm36_vm0, %v17_v13  ;;  %235 = vmatprep.mubr.msk.f32.mxu1 %vm36_vm0, %v21_v14 }
  0x14   :  { %230 = vmatmul.mubr.msk.f32.gmra.mrb[2].mxu0 %vm36_vm0, %v18_v15  ;;  %236 = vmatmul.mubr.msk.f32.gmra.mrb[2].mxu1 %vm36_vm0, %v22_v16 }
  0xe3   :  { %v228_v18 = vpop.f32.mrb[0].mxu0  ;;  %v234_v19 = vpop.f32.mrb[0].mxu1 }
  0xe4   :  { %v133_v20 = vadd.f32 %v228_v18, %v191_v17  ;;  %v153_v21 = vadd.f32 %v234_v19, %v191_v17  ;;  %v127_v22 = vpop.f32.mrb[1].mxu0  ;;  %v147_v23 = vpop.f32.mrb[1].mxu1 }
  0xe5   :  { %v128_v24 = vadd.f32 %v191_v17, %v127_v22  ;;  %v148_v25 = vadd.f32 %v191_v17, %v147_v23 }
  0xe6   :  { %168 = vst.msk [vmem:[#allocation2 + $0x8] sm:$0xff] %vm166_vm1, %v133_v20  ;;  %172 = vst.msk [vmem:[#allocation2 + $0x28] sm:$0xff] %vm166_vm1, %v153_v21 }
  0xe7   :  { %167 = vst.msk [vmem:[#allocation2] sm:$0xff] %vm166_vm1, %v128_v24  ;;  %171 = vst.msk [vmem:[#allocation2 + $0x20] sm:$0xff] %vm166_vm1, %v148_v25  ;;  %v231_v26 = vpop.f32.mrb[2].mxu0  ;;  %v237_v27 = vpop.f32.mrb[2].mxu1 }
  0xe8   :  { %v143_v28 = vadd.f32 %v231_v26, %v191_v17  ;;  %v163_v29 = vadd.f32 %v237_v27, %v191_v17  ;;  %v137_v30 = vpop.f32.mrb[3].mxu0  ;;  %v157_v31 = vpop.f32.mrb[3].mxu1 }
  0xe9   :  { %v138_v32 = vadd.f32 %v191_v17, %v137_v30  ;;  %v158_v33 = vadd.f32 %v191_v17, %v157_v31 }
  0xea   :  { %170 = vst.msk [vmem:[#allocation2 + $0x18] sm:$0xff] %vm166_vm1, %v143_v28  ;;  %174 = vst.msk [vmem:[#allocation2 + $0x38] sm:$0xff] %vm166_vm1, %v163_v29 }
  0xeb   :  { %169 = vst.msk [vmem:[#allocation2 + $0x10] sm:$0xff] %vm166_vm1, %v138_v32  ;;  %173 = vst.msk [vmem:[#allocation2 + $0x30] sm:$0xff] %vm166_vm1, %v158_v33 }
  0xec   :  { %270 = shalt.err (!%p267_p4)
}
  0xed   :  { %s271_s17 = scalar_lea.hbm %s382_s3, 1024 }
  0xee   :  { %p272_p5 = scmp.ne.s32.totalorder %s382_s3, %s271_s17  ;;  %p275_p6 = scmp.lt.u32.totalorder %s271_s17, %s382_s3 }
  0xf0   :  { %p277_p7 = pnand %p275_p6, %p272_p5 }
  0xf2   :  { %280 = shalt.err (!%p277_p7)
}
  0xf3   :  { %s284_s22 = smov 128   ;;  %s285_s23 = smov 8  }
  0xf4   :  { %186 = dma.vmem_to_hbm [thread:$0]  %s181_s15, 1024, %s382_s3, [#allocation3], %s284_s22, %s284_s22, %s285_s23  }
  0xf5   :  { %281 = dma.done.wait [#allocation3], 1024  }
  0xf6   :  { %282 = vsyncadd [#allocation3], 4294966272 }
  0xf7   :  { %190 = vsyncpa [#allocation3], 1 }

</bundles_post_ra>
